<compile_context>
chip_gen: v7x
topology: tpu7x:2x2x1
jax: 0.10.0
libtpu: 0.0.40
codegen_flags: <defaults>
</compile_context>

<pallas_src>
import functools

import jax
import jax.numpy as jnp
from jax.experimental import pallas as pl
from jax.experimental.pallas import tpu as pltpu


def _msc_kernel(x_ref, bits_ref, w_ref, b_ref, o_ref, *,
                num_samples, keep_thresh_i32, out_scale, use_dropout):
    """out_tile = dropout-stacked(x) @ W_big * out_scale + mean_bias."""
    x = x_ref[...]                                            # (tb, F_in) f32
    # Stack x along K: (tb, S*F_in). Concatenate along lanes is cheap/supported.
    x_big = jnp.concatenate([x] * num_samples, axis=1)

    if use_dropout:
        # Integer-domain dropout: bits are uniform int32; keep-probability is
        # exactly 1 - p (threshold precomputed in the wrapper).
        keep = bits_ref[...] >= jnp.int32(keep_thresh_i32)    # (tb, S*F_in)
        x_big = jnp.where(keep, x_big, 0.0)

    # Single stacked-K matmul on the MXU, bf16 inputs, f32 accumulation.
    acc = jnp.dot(x_big.astype(jnp.bfloat16), w_ref[...],
                  preferred_element_type=jnp.float32)         # (tb, tn)

    # Epilogue: fold 1/(1-p) and 1/S into one scalar, add the mean bias once.
    o_ref[...] = (acc * jnp.float32(out_scale) + b_ref[...]).astype(o_ref.dtype)


def multi_sample_classifier(x, weights, biases, seed, *, dropout_rate=0.5,
                            block_b=None, block_out=None):
    """
    x:       (B, F_in)          float32
    weights: (S, F_out, F_in)   float32   (PyTorch nn.Linear weight layout, stacked)
    biases:  (S, F_out)         float32
    seed:    int                base dropout seed
    returns  (B, F_out)         float32
    """
    S, F_out, F_in = weights.shape
    B = x.shape[0]
    K = S * F_in
    assert 0.0 <= dropout_rate < 1.0, "dropout_rate must be in [0, 1)"

    # Stacked (S*F_in, F_out) weight slab, bf16 for the MXU (kernel is
    # weight-DMA bound at small batch).
    # TODO(synk): for production, store weights pre-transposed/stacked so this
    # per-call transpose of the full weight tensor disappears.
    w_big = jnp.transpose(weights, (0, 2, 1)).reshape(K, F_out).astype(jnp.bfloat16)

    # Fold the S biases into one mean-bias row (added once in the epilogue).
    mean_bias = jnp.mean(biases.astype(jnp.float32), axis=0).reshape(1, F_out)

    use_dropout = dropout_rate > 0.0
    if use_dropout:
        # One (B, S*F_in) draw of uniform bits == independent mask per sample.
        key = jax.random.PRNGKey(seed)
        raw = jax.random.bits(key, (B, K), dtype=jnp.uint32)
        bits = jax.lax.bitcast_convert_type(raw, jnp.int32)   # uniform int32
        # keep iff u >= p * 2^32  (u uniform over 2^32 values) -> in signed
        # int32 domain the threshold is t - 2^31.
        t = min(int(round(dropout_rate * 2.0**32)), 2**32 - 1)
        keep_thresh_i32 = t - 2**31
        keep_scale = 1.0 / (1.0 - dropout_rate)
    else:
        bits = jnp.zeros((B, K), dtype=jnp.int32)
        keep_thresh_i32 = -(2**31)
        keep_scale = 1.0
    out_scale = keep_scale / float(S)

    tb = B if block_b is None else min(block_b, B)
    tn = F_out if block_out is None else min(block_out, F_out)
    grid = (pl.cdiv(B, tb), pl.cdiv(F_out, tn))

    kernel = functools.partial(
        _msc_kernel,
        num_samples=S,
        keep_thresh_i32=keep_thresh_i32,
        out_scale=out_scale,
        use_dropout=use_dropout,
    )

    # TODO(synk): for production shapes, pad F_out (and F_in) to multiples of
    # 128 for lane-dense stores, and add an "arbitrary" K-reduction axis if
    # S*F_in grows too large for a single VMEM weight slab (size it against
    # v7x's 64 MiB VMEM).
    return pl.pallas_call(
        kernel,
        out_shape=jax.ShapeDtypeStruct((B, F_out), jnp.float32),
        grid=grid,
        in_specs=[
            pl.BlockSpec((tb, F_in), lambda i, j: (i, 0)),     # x batch tile
            pl.BlockSpec((tb, K),    lambda i, j: (i, 0)),     # dropout bits
            pl.BlockSpec((K, tn),    lambda i, j: (0, j)),     # stacked weights
            pl.BlockSpec((1, tn),    lambda i, j: (0, j)),     # mean bias
        ],
        out_specs=pl.BlockSpec((tb, tn), lambda i, j: (i, j)),
        compiler_params=pltpu.CompilerParams(
            dimension_semantics=("parallel", "parallel"),      # no serial axis left
        ),
    )(x, bits, w_big, mean_bias)


def _init_params(key, num_samples, in_features, out_features):
    """Deterministic init matching nn.Linear's default U(-1/sqrt(fan_in), +)."""
    kw, kb = jax.random.split(key)
    bound = 1.0 / jnp.sqrt(jnp.float32(in_features))
    weights = jax.random.uniform(kw, (num_samples, out_features, in_features),
                                 jnp.float32, -bound, bound)
    biases = jax.random.uniform(kb, (num_samples, out_features),
                                jnp.float32, -bound, bound)
    return weights, biases


if __name__ == "__main__":
    B, F_IN, F_OUT, S = 8, 32, 16, 5
    DROPOUT = 0.5

    key = jax.random.PRNGKey(0)
    kx, kp = jax.random.split(key)
    x = jax.random.normal(kx, (B, F_IN), dtype=jnp.float32)
    weights, biases = _init_params(kp, S, F_IN, F_OUT)

    # Training-mode forward (independent dropout mask per sample).
    out = multi_sample_classifier(x, weights, biases, seed=0, dropout_rate=DROPOUT)
    out = jax.block_until_ready(out)
    assert out.shape == (B, F_OUT) and out.dtype == jnp.float32
    assert bool(jnp.all(jnp.isfinite(out)))

    # Dropout disabled -> must match a pure-JAX reference (same bf16 matmul inputs).
    out_nodrop = jax.block_until_ready(
        multi_sample_classifier(x, weights, biases, seed=0, dropout_rate=0.0))
    wt = jnp.transpose(weights, (0, 2, 1)).astype(jnp.bfloat16)
    ref = jnp.mean(
        jnp.einsum("bi,sio->sbo", x.astype(jnp.bfloat16), wt,
                   preferred_element_type=jnp.float32)
        + biases[:, None, :],
        axis=0)
    assert jnp.allclose(out_nodrop, ref, atol=1e-3, rtol=1e-3)

    print("KERNEL_OK")
</pallas_src>

<mosaic_0001>
module attributes {stable_mosaic.version = 11 : i64} {
  func.func @_msc_kernel(%arg0: i32, %arg1: i32, %arg2: memref<8x32xf32, #tpu.memory_space<vmem>>, %arg3: memref<8x160xi32, #tpu.memory_space<vmem>>, %arg4: memref<160x16xbf16, #tpu.memory_space<vmem>>, %arg5: memref<1x16xf32, #tpu.memory_space<vmem>>, %arg6: memref<8x16xf32, #tpu.memory_space<vmem>>) attributes {dimension_semantics = [#tpu.dimension_semantics<parallel>, #tpu.dimension_semantics<parallel>], iteration_bounds = array<i64: 1, 1>, scalar_prefetch = 0 : i64, scratch_operands = 0 : i64, tpu.core_type = #tpu.core_type<tc>, window_params = [{transform_indices = @transform_0, window_bounds = array<i64: 8, 32>}, {transform_indices = @transform_1, window_bounds = array<i64: 8, 160>}, {transform_indices = @transform_2, window_bounds = array<i64: 160, 16>}, {transform_indices = @transform_3, window_bounds = array<i64: 1, 16>}, {transform_indices = @transform_4, window_bounds = array<i64: 8, 16>}]} {
    %c0 = arith.constant 0 : index
    %c0_0 = arith.constant 0 : index
    %0 = vector.load %arg2[%c0, %c0_0] : memref<8x32xf32, #tpu.memory_space<vmem>>, vector<8x32xf32>
    %1 = tpu.concatenate %0, %0, %0, %0, %0 in 1 : vector<8x32xf32>, vector<8x32xf32>, vector<8x32xf32>, vector<8x32xf32>, vector<8x32xf32> -> vector<8x160xf32>
    %c0_1 = arith.constant 0 : index
    %c0_2 = arith.constant 0 : index
    %2 = vector.load %arg3[%c0_1, %c0_2] : memref<8x160xi32, #tpu.memory_space<vmem>>, vector<8x160xi32>
    %c0_i32 = arith.constant 0 : i32
    %3 = vector.broadcast %c0_i32 : i32 to vector<8x160xi32>
    %4 = arith.cmpi sge, %2, %3 : vector<8x160xi32>
    %cst = arith.constant 0.000000e+00 : f32
    %5 = vector.broadcast %cst : f32 to vector<8x160xf32>
    %6 = arith.select %4, %1, %5 : vector<8x160xi1>, vector<8x160xf32>
    %7 = arith.truncf %6 : vector<8x160xf32> to vector<8x160xbf16>
    %c0_3 = arith.constant 0 : index
    %c0_4 = arith.constant 0 : index
    %8 = vector.load %arg4[%c0_3, %c0_4] : memref<160x16xbf16, #tpu.memory_space<vmem>>, vector<160x16xbf16>
    %cst_5 = arith.constant dense<0.000000e+00> : vector<8x16xf32>
    %9 = tpu.matmul %7, %8, %cst_5 {dimension_numbers = #tpu.dot_dimension_numbers<[1], [0], [0], [1], [0, 0, 1, 1], [], []>} : vector<8x160xbf16>, vector<160x16xbf16>, vector<8x16xf32> -> vector<8x16xf32>
    %cst_6 = arith.constant 4.000000e-01 : f32
    %10 = vector.broadcast %cst_6 : f32 to vector<8x16xf32>
    %11 = arith.mulf %9, %10 : vector<8x16xf32>
    %c0_7 = arith.constant 0 : index
    %c0_8 = arith.constant 0 : index
    %12 = vector.load %arg5[%c0_7, %c0_8] : memref<1x16xf32, #tpu.memory_space<vmem>>, vector<1x16xf32>
    %13 = vector.broadcast %12 : vector<1x16xf32> to vector<8x16xf32>
    %14 = arith.addf %11, %13 : vector<8x16xf32>
    %c0_9 = arith.constant 0 : index
    %c0_10 = arith.constant 0 : index
    %15 = vector.load %arg6[%c0_9, %c0_10] : memref<8x16xf32, #tpu.memory_space<vmem>>, vector<8x16xf32>
    tpu.vector_store %arg6[%c0_9, %c0_10], %14 {strides = array<i32>} : memref<8x16xf32, #tpu.memory_space<vmem>>, vector<8x16xf32>,
    return
  }
  func.func @transform_0(%arg0: i32, %arg1: i32) -> (i32, i32) {
    %c0_i32 = arith.constant 0 : i32
    %c0_i32_0 = arith.constant 0 : i32
    return %arg0, %c0_i32 : i32, i32
  }
  func.func @transform_1(%arg0: i32, %arg1: i32) -> (i32, i32) {
    %c0_i32 = arith.constant 0 : i32
    %c0_i32_0 = arith.constant 0 : i32
    return %arg0, %c0_i32 : i32, i32
  }
  func.func @transform_2(%arg0: i32, %arg1: i32) -> (i32, i32) {
    %c0_i32 = arith.constant 0 : i32
    %c0_i32_0 = arith.constant 0 : i32
    return %c0_i32, %arg1 : i32, i32
  }
  func.func @transform_3(%arg0: i32, %arg1: i32) -> (i32, i32) {
    %c0_i32 = arith.constant 0 : i32
    %c0_i32_0 = arith.constant 0 : i32
    return %c0_i32, %arg1 : i32, i32
  }
  func.func @transform_4(%arg0: i32, %arg1: i32) -> (i32, i32) {
    %c0_i32 = arith.constant 0 : i32
    return %arg0, %arg1 : i32, i32
  }
}

</mosaic_0001>

<bundles_post_ra>
// kernel: tpu_custom_call.1
= control target key start
LH: loop header
LB: loop body
LE: loop exit
PB: predicated region body
PF: predicated region fallthrough
CT: control target
= control target key end

     0   :  { %s246_s17 = smov 32   ;;  %v247_v1 = vmov 0   ;;  %s248_s20 = smov 96   ;;  %s332_s0 = inlined_call_operand.vmem [shape: f32[8,32], index: 0, kind: input, shape index: {}]   ;;  %s333_s1 = inlined_call_operand.vmem [shape: s32[8,160], index: 1, kind: input, shape index: {}]   ;;  %s334_s2 = inlined_call_operand.vmem [shape: bf16[160,16], index: 2, kind: input, shape index: {}]   ;;  %s335_s3 = inlined_call_operand.vmem [shape: f32[1,16], index: 3, kind: input, shape index: {}]   ;;  %s336_s4 = inlined_call_operand.hbm [shape: f32[8,16], index: 4, kind: output, shape index: {}]  }
   0x1   :  { %v19_v0 = vld [vmem:[%s332_s0] sm:$0xff]  ;;  %127 = vmatprep.subr.bf16.mxu0 %v247_v1  ;;  %v213_v3 = vld [vmem:[%s334_s2 + $0x8] sm:$0xff]   ;;  %s249_s23 = smov 64   ;;  %v214_v4 = vld [vmem:[%s334_s2 + $0x10] sm:$0xff]  }
   0x2   :  { %21 = vrot.lane.b32.xlu0 %v19_v0, %s246_s17  ;;  %v212_v2 = vld [vmem:[%s334_s2] sm:$0xff]   ;;  %27 = vrot.lane.b32.xlu1 %v19_v0, %s248_s20  ;;  %v37_v5 = vld [vmem:[%s333_s1 + $0x8] sm:$0xff] }
   0x3   :  { %128 = vmatpush1.bf16.msra.mxu0 %v212_v2  ;;  %v215_v6 = vld [vmem:[%s334_s2 + $0x18] sm:$0xff]   ;;  %vm39_vm0 = vcmp.ge.s32.totalorder %v37_v5, 0 }
   0x4   :  { %129 = vmatprep.subr.bf16.mxu0 %v247_v1 }
   0x6   :  { %24 = vrot.lane.b32.xlu0 %v19_v0, %s249_s23 }
   0x7   :  { %130 = vmatpush1.bf16.msra.mxu0 %v213_v3 }
   0x8   :  { %131 = vmatprep.subr.bf16.mxu0 %v247_v1 }
   0xb   :  { %132 = vmatpush1.bf16.msra.mxu0 %v214_v4 }
   0xc   :  { %9 = vsyncpa [#allocation3], 0  ;;  %133 = vmatprep.subr.bf16.mxu0 %v247_v1  ;;  %v41_v7 = vsel %vm39_vm0, %v19_v0, 0.0  ;;  %vm30_vm1 = vcmask 261120   ;;  %v216_v9 = vld [vmem:[%s334_s2 + $0x20] sm:$0xff]   ;;  %v217_v10 = vld [vmem:[%s334_s2 + $0x28] sm:$0xff]  }
   0xd   :  { %v43_v8 = vpack.c.bf16 %v41_v7, %v41_v7  ;;  %v218_v11 = vld [vmem:[%s334_s2 + $0x30] sm:$0xff]   ;;  %v219_v12 = vld [vmem:[%s334_s2 + $0x38] sm:$0xff]   ;;  %v220_v13 = vld [vmem:[%s334_s2 + $0x40] sm:$0xff]   ;;  %vm32_vm2 = vcmask 523264   ;;  %vm34_vm3 = vcmask 785408   ;;  %s250_s18 = smov [#allocation2]  }
   0xe   :  { %v221_v14 = vld [vmem:[%s334_s2 + $0x48] sm:$0xff]   ;;  %v36_v16 = vld [vmem:[%s333_s1] sm:$0xff]  ;;  %s184_s19 = sshll.u32 %s250_s18, 4  ;;  %vm176_vm6 = vcmask 130048   ;;  %s185_s19 = int_to_ptr.vmem [resolvable:$true] %s184_s19 }
   0xf   :  { %134 = vmatpush1.bf16.msra.mxu0 %v215_v6  ;;  %202 = vmatprep.mubr.msk.bf16.mxu0 %vm30_vm1, %v43_v8  ;;  %vm38_vm4 = vcmp.ge.s32.totalorder %v36_v16, 0  ;;  %v206_v24 = vld [vmem:[%s335_s3] ss:$0 sm:$0xff]  ;;  %s222_s1 = scalar_lea.vmem %s185_s19, 128  ;;  %p227_p1 = scmp.lt.s32.totalorder %s185_s19, %s185_s19 }
  0x10   :  { %135 = vmatprep.subr.bf16.mxu0 %v247_v1  ;;  %vm203_vm5 = vmpackc.low %vm38_vm4, %vm38_vm4  ;;  %p223_p0 = scmp.ne.s32.totalorder %s185_s19, %s222_s1  ;;  %p228_p2 = scmp.lt.s32.totalorder %s222_s1, %s222_s1 }
  0x12   :  { %p229_p3 = por %p228_p2, %p227_p1 }
  0x13   :  { %136 = vmatpush1.bf16.msra.mxu0 %v216_v9 }
  0x14   :  { %137 = vmatprep.subr.bf16.mxu0 %v247_v1  ;;  %p230_p4 = pnand %p229_p3, %p223_p0 }
  0x17   :  { %138 = vmatpush1.bf16.msra.mxu0 %v217_v10 }
  0x18   :  { %139 = vmatprep.subr.bf16.mxu0 %v247_v1 }
  0x1b   :  { %140 = vmatpush1.bf16.msra.mxu0 %v218_v11 }
  0x1c   :  { %141 = vmatprep.subr.bf16.mxu0 %v247_v1 }
  0x1f   :  { %142 = vmatpush1.bf16.msra.mxu0 %v219_v12 }
  0x20   :  { %143 = vmatprep.subr.bf16.mxu0 %v247_v1 }
  0x23   :  { %144 = vmatpush1.bf16.msra.mxu0 %v220_v13 }
  0x24   :  { %145 = vmatprep.subr.bf16.mxu0 %v247_v1 }
  0x27   :  { %146 = vmatpush1.bf16.msra.mxu0 %v221_v14 }
  0x74   :  { %v22_v15 = vpop.permute.xlu0 %21  ;;  %v28_v17 = vpop.permute.xlu1 %27 }
  0x75   :  { %v31_v19 = vsel %vm30_vm1, %v19_v0, %v22_v15 }
  0x78   :  { %v25_v18 = vpop.permute.xlu0 %24 }
  0x79   :  { %v33_v20 = vsel %vm32_vm2, %v31_v19, %v25_v18 }
  0x7a   :  { %v35_v21 = vsel %vm34_vm3, %v33_v20, %v28_v17 }
  0x7b   :  { %v204_v22 = vpack.c.bf16 %v35_v21, %v35_v21 }
  0x7d   :  { %205 = vmatmul.mubr.msk.bf16.vlgmr.msra.gmra.mrb[0].mxu0 %vm203_vm5, %v204_v22 }
 0x150   :  { %v161_v23 = vpop.f32.mrb[0].mxu0 }
 0x151   :  { %v167_v25 = vmul.f32 0.4, %v161_v23  ;;  %v163_v26 = vpop.f32.mrb[1].mxu0 }
 0x152   :  { %v164_v27 = vpop.f32.mrb[2].mxu0 }
 0x153   :  { %v175_v28 = vadd.f32 %v206_v24, %v167_v25  ;;  %v165_v29 = vpop.f32.mrb[3].mxu0 }
 0x155   :  { %177 = vst.msk [vmem:[#allocation2] sm:$0xff] %vm176_vm6, %v175_v28 }
 0x156   :  { %233 = shalt.err (!%p230_p4)
}
 0x157   :  { %s234_s3 = scalar_lea.hbm %s336_s4, 128 }
 0x158   :  { %p235_p5 = scmp.ne.s32.totalorder %s336_s4, %s234_s3  ;;  %p238_p6 = scmp.lt.u32.totalorder %s234_s3, %s336_s4 }
 0x15a   :  { %p240_p7 = pnand %p238_p6, %p235_p5 }
 0x15c   :  { %243 = shalt.err (!%p240_p7)
}
 0x15d   :  { %187 = dma.vmem_to_hbm [thread:$0]  %s185_s19, 128, %s336_s4, [#allocation3]  }
 0x15e   :  { %244 = dma.done.wait [#allocation3], 128  }
 0x15f   :  { %245 = vsyncadd [#allocation3], 4294967168 }
 0x160   :  { %191 = vsyncpa [#allocation3], 1 }

</bundles_post_ra>
